<compile_context>
chip_gen: v7x
topology: tpu7x:2x2x1
jax: 0.10.0
libtpu: 0.0.40
codegen_flags: <defaults>
</compile_context>

<pallas_src>
import functools

import jax
import jax.numpy as jnp
from jax.experimental import pallas as pl
from jax.experimental.pallas import tpu as pltpu

ALPHA = 2.0      # matches align_loss(alpha=2)
_N_SPLITS = 2    # leading "parallel" grid axis (engages both TCs on v7x)


def _row_validity_mask(shape, tile_start, n_total):
    row = jax.lax.broadcasted_iota(jnp.int32, shape, 0)
    return (tile_start + row) < n_total


def _align_loss_kernel(x_ref, y_ref, o_ref, acc_ref, *,
                       n_total, tile_rows, tiles_per_split, alpha, any_pad):
    s = pl.program_id(0)   # split index (parallel across TensorCores on v7x)
    i = pl.program_id(1)   # row-tile index within the split (reduction axis)

    @pl.when(i == 0)
    def _init():
        acc_ref[...] = jnp.zeros_like(acc_ref)

    def partial_sum(mask_tile):
        # hot path: pure VPU sub/mul + add tree; no accumulator traffic per vreg.
        diff = x_ref[...].astype(jnp.float32) - y_ref[...].astype(jnp.float32)
        d2 = diff * diff
        tile_start = (s * tiles_per_split + i) * tile_rows
        if alpha == 2.0:
            # sum_rows ||x-y||^2 == sum of all squared entries: no row reduce.
            if mask_tile:
                d2 = jnp.where(
                    _row_validity_mask(d2.shape, tile_start, n_total), d2, 0.0)
            return jnp.sum(d2)
        else:
            sumsq = jnp.sum(d2, axis=1, keepdims=True)      # (tile_rows, 1)
            vals = jnp.power(sumsq, alpha * 0.5)            # ||x-y||^alpha
            if mask_tile:
                vals = jnp.where(
                    _row_validity_mask(vals.shape, tile_start, n_total),
                    vals, 0.0)
            return jnp.sum(vals)

    if any_pad:
        # Only tiles whose row range extends past N pay the mask cost; tiles
        # duplicated by the index-map clamp are fully masked (contribute 0).
        tile_end = (s * tiles_per_split + i + 1) * tile_rows
        is_partial = tile_end > n_total

        @pl.when(jnp.logical_not(is_partial))
        def _full_tile():
            acc_ref[...] += partial_sum(mask_tile=False)

        @pl.when(is_partial)
        def _partial_tile():
            acc_ref[...] += partial_sum(mask_tile=True)
    else:
        acc_ref[...] += partial_sum(mask_tile=False)

    @pl.when(i == pl.num_programs(1) - 1)
    def _finalize():
        # lane-dense (1, 8, 128) store of this split's partial sum
        o_ref[...] = jnp.broadcast_to(jnp.sum(acc_ref[...]), o_ref.shape)


def _vmem_capacity_bytes():
    try:
        return int(pltpu.get_tpu_info().vmem_capacity_bytes)
    except Exception:
        return 64 * 1024 * 1024   # conservative fallback (v7x per-core VMEM)


def align_loss(x, y, *, alpha=ALPHA, tile_rows=None):
    """Pallas TPU implementation of align_loss.forward for 2-D inputs (N, D)."""
    assert x.shape == y.shape and x.ndim == 2
    n, d = x.shape
    in_el = jnp.dtype(x.dtype).itemsize

    vmem_cap = _vmem_capacity_bytes()
    # ~80 MiB working budget on 128-MiB parts (v5e/v6e), ~40 MiB on v7x.
    budget = (vmem_cap * 5) // 8

    n_pad = ((n + 31) // 32) * 32
    if tile_rows is None:
        # bytes/row: 2 inputs x 2 pipeline buffers + allowance for the f32
        # full-block temporaries (diff / d2 / mask) inside the kernel body.
        per_row = d * (4 * in_el + 12)
        t = budget // per_row
        t = min(int(t), (16 * 1024 * 1024) // (d * in_el))  # <=16 MiB / input block
        t = max(32, min(int(t), 1 << 16))
        t = (t // 32) * 32
        tile_rows = min(t, n_pad)
    assert tile_rows % 32 == 0, "tile_rows must be a multiple of 32"

    num_tiles = pl.cdiv(n, tile_rows)
    n_splits = _N_SPLITS if num_tiles >= _N_SPLITS else 1
    tiles_per_split = pl.cdiv(num_tiles, n_splits)
    covered_rows = n_splits * tiles_per_split * tile_rows
    any_pad = covered_rows > n

    def in_index_map(si, ti):
        t_idx = si * tiles_per_split + ti
        # Clamp padded/duplicate tiles onto the last real tile; the kernel
        # masks their contribution to exactly zero.
        return (jnp.minimum(t_idx, num_tiles - 1), 0)

    block_in_bytes = tile_rows * d * in_el
    block_f32_bytes = tile_rows * d * 4
    vmem_need = 2 * 2 * block_in_bytes + 3 * block_f32_bytes + (2 << 20)
    vmem_limit = int(min(max(vmem_need, 32 * 1024 * 1024),
                         vmem_cap - (4 * 1024 * 1024)))

    kernel = functools.partial(
        _align_loss_kernel,
        n_total=n,
        tile_rows=tile_rows,
        tiles_per_split=tiles_per_split,
        alpha=float(alpha),
        any_pad=any_pad,
    )

    cost = pl.CostEstimate(
        flops=3 * n * d,
        transcendentals=0 if alpha == 2.0 else n,
        bytes_accessed=2 * n * d * in_el + n_splits * 8 * 128 * 4,
    )

    out = pl.pallas_call(
        kernel,
        out_shape=jax.ShapeDtypeStruct((n_splits, 8, 128), jnp.float32),
        grid_spec=pltpu.PrefetchScalarGridSpec(
            num_scalar_prefetch=0,
            grid=(n_splits, tiles_per_split),
            in_specs=[
                pl.BlockSpec((tile_rows, d), in_index_map),
                pl.BlockSpec((tile_rows, d), in_index_map),
            ],
            out_specs=pl.BlockSpec((1, 8, 128), lambda si, ti: (si, 0, 0)),
            scratch_shapes=[pltpu.VMEM((1, 1), jnp.float32)],
        ),
        compiler_params=pltpu.CompilerParams(
            dimension_semantics=("parallel", "arbitrary"),
            vmem_limit_bytes=vmem_limit,
        ),
        cost_estimate=cost,
    )(x, y)

    # per-split partial sums -> mean over rows
    return jnp.sum(out[:, 0, 0]) / jnp.float32(n)


if __name__ == "__main__":
    key = jax.random.PRNGKey(0)
    kx, ky = jax.random.split(key)
    N, D = 80, 96   # small embedding pair; not a multiple of the forced tile
    x = jax.random.normal(kx, (N, D), dtype=jnp.float32)
    y = jax.random.normal(ky, (N, D), dtype=jnp.float32)

    # pure-JAX references of the PyTorch semantics
    ref2 = jnp.mean(jnp.power(jnp.linalg.norm(x - y, axis=1), 2.0))
    ref3 = jnp.mean(jnp.power(jnp.linalg.norm(x - y, axis=1), 3.0))

    # auto-sized tile: single tile, single split, masked remainder rows
    loss_auto = jax.block_until_ready(align_loss(x, y))
    # forced small tile: 3 row-tiles -> 2-way split grid with a clamped
    # duplicate tile and a partially-masked tile
    loss_tiled = jax.block_until_ready(align_loss(x, y, tile_rows=32))
    # generic-alpha (per-row reduce + pow) path
    loss_a3 = jax.block_until_ready(align_loss(x, y, alpha=3.0, tile_rows=32))

    assert jnp.allclose(loss_auto, ref2, rtol=1e-5, atol=1e-5), (loss_auto, ref2)
    assert jnp.allclose(loss_tiled, ref2, rtol=1e-5, atol=1e-5), (loss_tiled, ref2)
    assert jnp.allclose(loss_a3, ref3, rtol=1e-4, atol=1e-4), (loss_a3, ref3)
    print("KERNEL_OK")
</pallas_src>

<mosaic_0001>
module attributes {stable_mosaic.version = 11 : i64} {
  func.func @_align_loss_kernel(%arg0: i32, %arg1: i32, %arg2: memref<96x96xf32, #tpu.memory_space<vmem>>, %arg3: memref<96x96xf32, #tpu.memory_space<vmem>>, %arg4: memref<1x8x128xf32, #tpu.memory_space<vmem>>, %arg5: memref<1x1xf32, #tpu.memory_space<vmem>>) attributes {dimension_semantics = [#tpu.dimension_semantics<parallel>, #tpu.dimension_semantics<arbitrary>], iteration_bounds = array<i64: 1, 1>, scalar_prefetch = 0 : i64, scratch_operands = 1 : i64, tpu.core_type = #tpu.core_type<tc>, window_params = [{transform_indices = @transform_0, window_bounds = array<i64: 96, 96>}, {transform_indices = @transform_1, window_bounds = array<i64: 96, 96>}, {transform_indices = @transform_2, window_bounds = array<i64: 1, 8, 128>}]} {
    %c0_i32 = arith.constant 0 : i32
    %0 = arith.cmpi eq, %arg1, %c0_i32 : i32
    %1 = arith.extui %0 : i1 to i32
    %c0_i32_0 = arith.constant 0 : i32
    %2 = arith.cmpi ne, %1, %c0_i32_0 : i32
    scf.if %2 {
      %cst = arith.constant 0.000000e+00 : f32
      %16 = vector.broadcast %cst : f32 to vector<1x1xf32>
      %c0 = arith.constant 0 : index
      %c0_6 = arith.constant 0 : index
      %17 = vector.load %arg5[%c0, %c0_6] : memref<1x1xf32, #tpu.memory_space<vmem>>, vector<1x1xf32>
      tpu.vector_store %arg5[%c0, %c0_6], %16 {strides = array<i32>} : memref<1x1xf32, #tpu.memory_space<vmem>>, vector<1x1xf32>,
    } else {
    }
    %c1_i32 = arith.constant 1 : i32
    %3 = arith.muli %arg0, %c1_i32 : i32
    %4 = arith.addi %3, %arg1 : i32
    %c1_i32_1 = arith.constant 1 : i32
    %5 = arith.addi %4, %c1_i32_1 : i32
    %c96_i32 = arith.constant 96 : i32
    %6 = arith.muli %5, %c96_i32 : i32
    %c80_i32 = arith.constant 80 : i32
    %7 = arith.cmpi sgt, %6, %c80_i32 : i32
    %true = arith.constant true
    %8 = arith.xori %7, %true : i1
    %9 = arith.extui %8 : i1 to i32
    %c0_i32_2 = arith.constant 0 : i32
    %10 = arith.cmpi ne, %9, %c0_i32_2 : i32
    scf.if %10 {
      %c0 = arith.constant 0 : index
      %c0_6 = arith.constant 0 : index
      %16 = vector.load %arg5[%c0, %c0_6] : memref<1x1xf32, #tpu.memory_space<vmem>>, vector<1x1xf32>
      %c0_7 = arith.constant 0 : index
      %c0_8 = arith.constant 0 : index
      %17 = vector.load %arg2[%c0_7, %c0_8] : memref<96x96xf32, #tpu.memory_space<vmem>>, vector<96x96xf32>
      %c0_9 = arith.constant 0 : index
      %c0_10 = arith.constant 0 : index
      %18 = vector.load %arg3[%c0_9, %c0_10] : memref<96x96xf32, #tpu.memory_space<vmem>>, vector<96x96xf32>
      %19 = arith.subf %17, %18 : vector<96x96xf32>
      %20 = arith.mulf %19, %19 : vector<96x96xf32>
      %21 = vector.shape_cast %20 : vector<96x96xf32> to vector<1x96x96xf32>
      %cst = arith.constant dense<0.000000e+00> : vector<1xf32>
      %22 = vector.multi_reduction <add>, %21, %cst [1, 2] : vector<1x96x96xf32> to vector<1xf32>
      %23 = vector.shape_cast %22 : vector<1xf32> to vector<1x1x1xf32>
      %24 = vector.extract %23[0, 0, 0] : f32 from vector<1x1x1xf32>
      %25 = vector.broadcast %24 : f32 to vector<1x1xf32>
      %26 = arith.addf %16, %25 : vector<1x1xf32>
      %c0_11 = arith.constant 0 : index
      %c0_12 = arith.constant 0 : index
      %27 = vector.load %arg5[%c0_11, %c0_12] : memref<1x1xf32, #tpu.memory_space<vmem>>, vector<1x1xf32>
      tpu.vector_store %arg5[%c0_11, %c0_12], %26 {strides = array<i32>} : memref<1x1xf32, #tpu.memory_space<vmem>>, vector<1x1xf32>,
    } else {
    }
    %11 = arith.extui %7 : i1 to i32
    %c0_i32_3 = arith.constant 0 : i32
    %12 = arith.cmpi ne, %11, %c0_i32_3 : i32
    scf.if %12 {
      %c0 = arith.constant 0 : index
      %c0_6 = arith.constant 0 : index
      %16 = vector.load %arg5[%c0, %c0_6] : memref<1x1xf32, #tpu.memory_space<vmem>>, vector<1x1xf32>
      %c0_7 = arith.constant 0 : index
      %c0_8 = arith.constant 0 : index
      %17 = vector.load %arg2[%c0_7, %c0_8] : memref<96x96xf32, #tpu.memory_space<vmem>>, vector<96x96xf32>
      %c0_9 = arith.constant 0 : index
      %c0_10 = arith.constant 0 : index
      %18 = vector.load %arg3[%c0_9, %c0_10] : memref<96x96xf32, #tpu.memory_space<vmem>>, vector<96x96xf32>
      %19 = arith.subf %17, %18 : vector<96x96xf32>
      %20 = arith.mulf %19, %19 : vector<96x96xf32>
      %c1_i32_11 = arith.constant 1 : i32
      %21 = arith.muli %arg0, %c1_i32_11 : i32
      %22 = arith.addi %21, %arg1 : i32
      %c96_i32_12 = arith.constant 96 : i32
      %23 = arith.muli %22, %c96_i32_12 : i32
      %24 = tpu.iota {dimensions = array<i32: 0>} : vector<96x96xi32>
      %25 = vector.broadcast %23 : i32 to vector<96x96xi32>
      %26 = arith.addi %25, %24 : vector<96x96xi32>
      %c80_i32_13 = arith.constant 80 : i32
      %27 = vector.broadcast %c80_i32_13 : i32 to vector<96x96xi32>
      %28 = arith.cmpi slt, %26, %27 : vector<96x96xi32>
      %cst = arith.constant 0.000000e+00 : f32
      %29 = vector.broadcast %cst : f32 to vector<96x96xf32>
      %30 = arith.select %28, %20, %29 : vector<96x96xi1>, vector<96x96xf32>
      %31 = vector.shape_cast %30 : vector<96x96xf32> to vector<1x96x96xf32>
      %cst_14 = arith.constant dense<0.000000e+00> : vector<1xf32>
      %32 = vector.multi_reduction <add>, %31, %cst_14 [1, 2] : vector<1x96x96xf32> to vector<1xf32>
      %33 = vector.shape_cast %32 : vector<1xf32> to vector<1x1x1xf32>
      %34 = vector.extract %33[0, 0, 0] : f32 from vector<1x1x1xf32>
      %35 = vector.broadcast %34 : f32 to vector<1x1xf32>
      %36 = arith.addf %16, %35 : vector<1x1xf32>
      %c0_15 = arith.constant 0 : index
      %c0_16 = arith.constant 0 : index
      %37 = vector.load %arg5[%c0_15, %c0_16] : memref<1x1xf32, #tpu.memory_space<vmem>>, vector<1x1xf32>
      tpu.vector_store %arg5[%c0_15, %c0_16], %36 {strides = array<i32>} : memref<1x1xf32, #tpu.memory_space<vmem>>, vector<1x1xf32>,
    } else {
    }
    %c0_i32_4 = arith.constant 0 : i32
    %13 = arith.cmpi eq, %arg1, %c0_i32_4 : i32
    %14 = arith.extui %13 : i1 to i32
    %c0_i32_5 = arith.constant 0 : i32
    %15 = arith.cmpi ne, %14, %c0_i32_5 : i32
    scf.if %15 {
      %c0 = arith.constant 0 : index
      %c0_6 = arith.constant 0 : index
      %16 = vector.load %arg5[%c0, %c0_6] : memref<1x1xf32, #tpu.memory_space<vmem>>, vector<1x1xf32>
      %17 = vector.shape_cast %16 : vector<1x1xf32> to vector<1x1x1xf32>
      %cst = arith.constant dense<0.000000e+00> : vector<1xf32>
      %18 = vector.multi_reduction <add>, %17, %cst [1, 2] : vector<1x1x1xf32> to vector<1xf32>
      %19 = vector.shape_cast %18 : vector<1xf32> to vector<1x1x1xf32>
      %20 = vector.extract %19[0, 0, 0] : f32 from vector<1x1x1xf32>
      %21 = vector.broadcast %20 : f32 to vector<1x8x128xf32>
      %c0_7 = arith.constant 0 : index
      %c0_8 = arith.constant 0 : index
      %c0_9 = arith.constant 0 : index
      %22 = vector.load %arg4[%c0_7, %c0_8, %c0_9] : memref<1x8x128xf32, #tpu.memory_space<vmem>>, vector<1x8x128xf32>
      tpu.vector_store %arg4[%c0_7, %c0_8, %c0_9], %21 {strides = array<i32>} : memref<1x8x128xf32, #tpu.memory_space<vmem>>, vector<1x8x128xf32>,
    } else {
    }
    return
  }
  func.func @transform_0(%arg0: i32, %arg1: i32) -> (i32, i32) {
    %c1_i32 = arith.constant 1 : i32
    %0 = arith.muli %arg0, %c1_i32 : i32
    %1 = arith.addi %0, %arg1 : i32
    %c0_i32 = arith.constant 0 : i32
    %2 = arith.minsi %1, %c0_i32 : i32
    %c0_i32_0 = arith.constant 0 : i32
    %c0_i32_1 = arith.constant 0 : i32
    return %2, %c0_i32_0 : i32, i32
  }
  func.func @transform_1(%arg0: i32, %arg1: i32) -> (i32, i32) {
    %c1_i32 = arith.constant 1 : i32
    %0 = arith.muli %arg0, %c1_i32 : i32
    %1 = arith.addi %0, %arg1 : i32
    %c0_i32 = arith.constant 0 : i32
    %2 = arith.minsi %1, %c0_i32 : i32
    %c0_i32_0 = arith.constant 0 : i32
    %c0_i32_1 = arith.constant 0 : i32
    return %2, %c0_i32_0 : i32, i32
  }
  func.func @transform_2(%arg0: i32, %arg1: i32) -> (i32, i32, i32) {
    %c0_i32 = arith.constant 0 : i32
    %c0_i32_0 = arith.constant 0 : i32
    %c0_i32_1 = arith.constant 0 : i32
    return %arg0, %c0_i32, %c0_i32_0 : i32, i32, i32
  }
}

</mosaic_0001>

<bundles_post_ra>
// kernel: tpu_custom_call.1
= control target key start
LH: loop header
LB: loop body
LE: loop exit
PB: predicated region body
PF: predicated region fallthrough
CT: control target
= control target key end

     0   :  { %7 = vsyncpa [#allocation4], 0  ;;  %s489_s0 = inlined_call_operand.hbm [shape: f32[80,96], index: 0, kind: input, shape index: {}]   ;;  %s490_s1 = inlined_call_operand.hbm [shape: f32[80,96], index: 1, kind: input, shape index: {}]   ;;  %s491_s2 = inlined_call_operand.hbm [shape: f32[1,8,128], index: 2, kind: output, shape index: {}]  }
   0x1   :  { %8 = vsyncpa [#allocation7], 0 }
   0x2   :  { %9 = vsyncpa [#allocation5], 0 }
   0x3   :  { %20 = vsyncadd [#allocation4], 256  ;;  %s422_s9 = smov [#allocation3]   ;;  %s350_s13 = scalar_lea.hbm %s489_s0, 1280 }
   0x4   :  { %s25_s10 = sshll.u32 %s422_s9, 4  ;;  %p351_p0 = scmp.ne.s32.totalorder %s489_s0, %s350_s13  ;;  %s26_s10 = int_to_ptr.vmem [resolvable:$true] %s25_s10 }
   0x5   :  { %p354_p1 = scmp.lt.u32.totalorder %s350_s13, %s489_s0 }
   0x7   :  { %p356_p2 = pnand %p354_p1, %p351_p0 }
   0x9   :  { %359 = shalt.err (!%p356_p2)
}
   0xa   :  { %s360_s18 = scalar_lea.vmem %s26_s10, 1280  ;;  %s364_s19 = scalar_lea.vmem %s26_s10, 1536 }
   0xb   :  { %p361_p3 = scmp.ne.s32.totalorder %s26_s10, %s360_s18  ;;  %p365_p4 = scmp.lt.s32.totalorder %s26_s10, %s26_s10 }
   0xc   :  { %p366_p5 = scmp.lt.s32.totalorder %s364_s19, %s360_s18 }
   0xe   :  { %p367_p6 = por %p366_p5, %p365_p4 }
  0x10   :  { %p368_p7 = pnand %p367_p6, %p361_p3 }
  0x12   :  { %371 = shalt.err (!%p368_p7)
}
  0x13   :  { %s423_s20 = smov 128   ;;  %s424_s21 = smov 8  }
  0x14   :  { %31 = dma.hbm_to_vmem [thread:$0]  %s489_s0, 1280, %s26_s10, [#allocation4], %s423_s20, %s423_s20, %s424_s21  }
  0x15   :  { %42 = vsyncadd [#allocation7], 256  ;;  %s425_s24 = smov [#allocation6]   ;;  %s372_s28 = scalar_lea.hbm %s490_s1, 1280 }
  0x16   :  { %s47_s25 = sshll.u32 %s425_s24, 4  ;;  %p373_p8 = scmp.ne.s32.totalorder %s490_s1, %s372_s28  ;;  %s48_s25 = int_to_ptr.vmem [resolvable:$true] %s47_s25 }
  0x17   :  { %p376_p9 = scmp.lt.u32.totalorder %s372_s28, %s490_s1 }
  0x19   :  { %p378_p10 = pnand %p376_p9, %p373_p8 }
  0x1b   :  { %381 = shalt.err (!%p378_p10)
}
  0x1c   :  { %s382_s5 = scalar_lea.vmem %s48_s25, 1280  ;;  %s386_s0 = scalar_lea.vmem %s48_s25, 1536 }
  0x1d   :  { %p383_p11 = scmp.ne.s32.totalorder %s48_s25, %s382_s5  ;;  %p387_p12 = scmp.lt.s32.totalorder %s48_s25, %s48_s25 }
  0x1e   :  { %p388_p13 = scmp.lt.s32.totalorder %s386_s0, %s382_s5 }
  0x20   :  { %p389_p0 = por %p388_p13, %p387_p12 }
  0x22   :  { %p390_p1 = pnand %p389_p0, %p383_p11 }
  0x24   :  { %393 = shalt.err (!%p390_p1)
}
  0x25   :  { %53 = dma.hbm_to_vmem [thread:$0]  %s490_s1, 1280, %s48_s25, [#allocation7], %s423_s20, %s423_s20, %s424_s21  }
  0x26   :  { %416 = dma.done.wait [#allocation4], 1536  }
  0x27   :  { %417 = vsyncadd [#allocation4], 4294965760 }
  0x28   :  { %418 = dma.done.wait [#allocation7], 1536  }
  0x29   :  { %419 = vsyncadd [#allocation7], 4294965760  ;;  %v176_v0 = vld [vmem:[#allocation3] sm:$0xff]  ;;  %v177_v1 = vld [vmem:[#allocation3 + $0x8] sm:$0xff]  ;;  %vm275_vm0 = vcmask 785408   ;;  %vm76_vm1 = vcmask 0  }
  0x2a   :  { %v178_v2 = vld [vmem:[#allocation3 + $0x10] sm:$0xff]  ;;  %v179_v3 = vld [vmem:[#allocation3 + $0x18] sm:$0xff]  ;;  %v180_v4 = vld [vmem:[#allocation3 + $0x20] sm:$0xff]  ;;  %v426_v59 = vmov 0.0   ;;  %s427_s8 = smov [#allocation8]  }
  0x2b   :  { %v188_v5 = vld [vmem:[#allocation6] sm:$0xff]  ;;  %v189_v6 = vld [vmem:[#allocation6 + $0x8] sm:$0xff]  ;;  %v190_v7 = vld [vmem:[#allocation6 + $0x10] sm:$0xff]  ;;  %77 = vst.msk [vmem:[#allocation2] sm:$0x1] %vm76_vm1, %v426_v59  ;;  %s326_s9 = sshll.u32 %s427_s8, 4  ;;  %s327_s9 = int_to_ptr.vmem [resolvable:$true] %s326_s9 }
  0x2c   :  { %v191_v8 = vld [vmem:[#allocation6 + $0x18] sm:$0xff]  ;;  %v192_v9 = vld [vmem:[#allocation6 + $0x20] sm:$0xff]  ;;  %v200_v10 = vsub.f32 %v176_v0, %v188_v5  ;;  %v201_v11 = vsub.f32 %v177_v1, %v189_v6  ;;  %v181_v12 = vld [vmem:[#allocation3 + $0x28] sm:$0xff]  ;;  %v202_v14 = vsub.f32 %v178_v2, %v190_v7  ;;  %s394_s11 = scalar_lea.vmem %s327_s9, 128  ;;  %p399_p3 = scmp.lt.s32.totalorder %s327_s9, %s327_s9 }
  0x2d   :  { %v193_v13 = vld [vmem:[#allocation6 + $0x28] sm:$0xff]  ;;  %v203_v15 = vsub.f32 %v179_v3, %v191_v8  ;;  %v204_v16 = vsub.f32 %v180_v4, %v192_v9  ;;  %v182_v18 = vld [vmem:[#allocation3 + $0x30] sm:$0xff]  ;;  %v183_v24 = vld [vmem:[#allocation3 + $0x38] sm:$0xff]  ;;  %p395_p2 = scmp.ne.s32.totalorder %s327_s9, %s394_s11  ;;  %p400_p4 = scmp.lt.s32.totalorder %s394_s11, %s394_s11 }
  0x2e   :  { %v212_v17 = vmul.f32 %v200_v10, %v200_v10  ;;  %v194_v19 = vld [vmem:[#allocation6 + $0x30] sm:$0xff]  ;;  %v213_v20 = vmul.f32 %v201_v11, %v201_v11  ;;  %v214_v21 = vmul.f32 %v202_v14, %v202_v14  ;;  %v205_v22 = vsub.f32 %v181_v12, %v193_v13  ;;  %v195_v25 = vld [vmem:[#allocation6 + $0x38] sm:$0xff]  ;;  %v184_v31 = vld [vmem:[#allocation3 + $0x40] sm:$0xff] }
  0x2f   :  { %v215_v23 = vmul.f32 %v203_v15, %v203_v15  ;;  %v206_v27 = vsub.f32 %v182_v18, %v194_v19  ;;  %v216_v28 = vmul.f32 %v204_v16, %v204_v16  ;;  %v196_v32 = vld [vmem:[#allocation6 + $0x40] sm:$0xff]  ;;  %v207_v34 = vsub.f32 %v183_v24, %v195_v25  ;;  %v185_v37 = vld [vmem:[#allocation3 + $0x48] sm:$0xff]  ;;  %p401_p5 = por %p400_p4, %p399_p3 }
  0x30   :  { %v276_v26 = vsel %vm275_vm0, %v212_v17, 0.0  ;;  %v277_v29 = vsel %vm275_vm0, %v213_v20, 0.0  ;;  %v279_v30 = vsel %vm275_vm0, %v214_v21, 0.0  ;;  %v217_v35 = vmul.f32 %v205_v22, %v205_v22  ;;  %v197_v38 = vld [vmem:[#allocation6 + $0x48] sm:$0xff] }
  0x31   :  { %v278_v33 = vadd.f32 %v277_v29, %v276_v26  ;;  %v281_v36 = vsel %vm275_vm0, %v215_v23, 0.0  ;;  %v208_v40 = vsub.f32 %v184_v31, %v196_v32  ;;  %v218_v41 = vmul.f32 %v206_v27, %v206_v27  ;;  %p402_p6 = pnand %p401_p5, %p395_p2 }
  0x32   :  { %v283_v42 = vsel %vm275_vm0, %v216_v28, 0.0  ;;  %v209_v44 = vsub.f32 %v185_v37, %v197_v38  ;;  %v219_v45 = vmul.f32 %v207_v34, %v207_v34  ;;  %v285_v46 = vsel %vm275_vm0, %v217_v35, 0.0  ;;  %v175_v3 = vld [vmem:[#allocation2] sm:$0x1] }
  0x33   :  { %v280_v39 = vadd.f32 %v279_v30, %v278_v33  ;;  %v220_v48 = vmul.f32 %v208_v40, %v208_v40  ;;  %v287_v49 = vsel %vm275_vm0, %v218_v41, 0.0 }
  0x34   :  { %v221_v51 = vmul.f32 %v209_v44, %v209_v44  ;;  %v289_v52 = vsel %vm275_vm0, %v219_v45, 0.0 }
  0x35   :  { %v282_v43 = vadd.f32 %v281_v36, %v280_v39  ;;  %v291_v54 = vsel %vm275_vm0, %v220_v48, 0.0 }
  0x36   :  { %v293_v56 = vsel %vm275_vm0, %v221_v51, 0.0 }
  0x37   :  { %v284_v47 = vadd.f32 %v283_v42, %v282_v43 }
  0x39   :  { %v286_v50 = vadd.f32 %v285_v46, %v284_v47 }
  0x3b   :  { %v288_v53 = vadd.f32 %v287_v49, %v286_v50 }
  0x3d   :  { %v290_v55 = vadd.f32 %v289_v52, %v288_v53 }
  0x3f   :  { %v292_v57 = vadd.f32 %v291_v54, %v290_v55 }
  0x41   :  { %v294_v58 = vadd.f32 %v293_v56, %v292_v57 }
  0x43   :  { %299 = vadd.xlane.f32.xlu0 %v294_v58 }
  0xd0   :  { %v300_v60 = vpop.xlane.xlu0 %299 }
  0xd1   :  { %v301_v61 = vrot.slane %v300_v60, 4 }
  0xd3   :  { %v302_v62 = vadd.f32 %v301_v61, %v300_v60 }
  0xd5   :  { %v303_v63 = vrot.slane %v302_v62, 2 }
  0xd7   :  { %v304_v0 = vadd.f32 %v303_v63, %v302_v62 }
  0xd9   :  { %v305_v1 = vrot.slane %v304_v0, 1 }
  0xdb   :  { %v306_v2 = vadd.f32 %v305_v1, %v304_v0 }
  0xdd   :  { %340 = vpush %v306_v2 }
 0x10e   :  { %s341_s1 = spop %340 }
 0x10f   :  { %v308_v4 = vstv %s341_s1 }
 0x110   :  { %v309_v5 = vadd.f32 %v308_v4, %v175_v3 }
 0x112   :  { %311 = vst.msk [vmem:[#allocation2] sm:$0x1] %vm76_vm1, %v309_v5 }
 0x119   :  { %v315_v6 = vld [vmem:[#allocation2] sm:$0x1] }
 0x11a   :  { %342 = vpush %v315_v6 }
 0x14b   :  { %s343_s10 = spop %342 }
 0x14c   :  { %v318_v7 = vstv %s343_s10 }
 0x14d   :  { %319 = vst [vmem:[#allocation8] sm:$0xff] %v318_v7 }
 0x14e   :  { %405 = shalt.err (!%p402_p6)
}
 0x14f   :  { %s406_s14 = scalar_lea.hbm %s491_s2, 128 }
 0x150   :  { %p407_p7 = scmp.ne.s32.totalorder %s491_s2, %s406_s14  ;;  %p410_p8 = scmp.lt.u32.totalorder %s406_s14, %s491_s2 }
 0x152   :  { %p412_p9 = pnand %p410_p8, %p407_p7 }
 0x154   :  { %415 = shalt.err (!%p412_p9)
}
 0x155   :  { %329 = dma.vmem_to_hbm [thread:$0]  %s327_s9, 128, %s491_s2, [#allocation5]  }
 0x156   :  { %420 = dma.done.wait [#allocation5], 128  }
 0x157   :  { %421 = vsyncadd [#allocation5], 4294967168 }
 0x158   :  { %333 = vsyncpa [#allocation4], 1 }
 0x159   :  { %334 = vsyncpa [#allocation7], 1 }
 0x15a   :  { %335 = vsyncpa [#allocation5], 1 }

</bundles_post_ra>
